<compile_context>
chip_gen: v5e
topology: v5e:2x2
jax: 0.10.0
libtpu: 0.0.40
codegen_flags: <defaults>
</compile_context>

<pallas_src>
import math

import jax
import jax.numpy as jnp
from jax.experimental import pallas as pl
from jax.experimental.pallas import tpu as pltpu

_SINGLE_DMA_BYTES = 1 << 20      # below this: one DMA, no chunking at all
_TARGET_CHUNK_BYTES = 2 << 20    # aim ~2 MiB per in-flight DMA
_MAX_CHUNKS_SMALL = 8
_MAX_CHUNKS_LARGE = 16           # >= 64 MiB: a bit more concurrency (v7x HBM BW)
_LARGE_BYTES = 64 << 20


def _plan_chunks(shape, itemsize):
    """Static slice tuples (one per DMA), chosen by bytes, not leading-dim count."""
    total_bytes = math.prod(shape) * itemsize
    lead = shape[0]

    if total_bytes <= _SINGLE_DMA_BYTES:
        # Tiny input: a single DMA covering the whole array.
        return [(slice(0, lead),)]

    max_chunks = _MAX_CHUNKS_LARGE if total_bytes >= _LARGE_BYTES else _MAX_CHUNKS_SMALL
    want = max(1, min(max_chunks, total_bytes // _TARGET_CHUNK_BYTES))

    if lead >= want or len(shape) < 2:
        # Enough rows along the leading (major-most, contiguous) axis.
        n = max(1, min(want, lead))
        bounds = [(lead * c) // n for c in range(n + 1)]
        return [(slice(bounds[c], bounds[c + 1]),)
                for c in range(n) if bounds[c + 1] > bounds[c]]

    # Low-batch but large tensor: also split the second axis so >= `want`
    # DMAs are concurrently in flight.  (Two levels is enough in practice.)
    per_lead = min(-(-want // lead), shape[1])
    bounds = [(shape[1] * c) // per_lead for c in range(per_lead + 1)]
    out = []
    for i in range(lead):
        for c in range(per_lead):
            if bounds[c + 1] > bounds[c]:
                out.append((slice(i, i + 1), slice(bounds[c], bounds[c + 1])))
    return out


def _make_identity_dma_kernel(chunks):
    """Kernel copying x -> o with one HBM->HBM DMA per static chunk."""

    def kernel(x_ref, o_ref, sems):
        copies = []
        for k, sl in enumerate(chunks):
            cp = pltpu.make_async_copy(x_ref.at[sl], o_ref.at[sl], sems.at[k])
            cp.start()
            copies.append(cp)
        # All DMAs are in flight; now block on each completion.
        for cp in copies:
            cp.wait()

    return kernel


def _padded_bytes(shape, itemsize):
    """Approximate HBM traffic incl. (sublane, lane) tile padding of minor dims."""
    if len(shape) == 0:
        return itemsize
    sublane = {4: 8, 2: 16, 1: 32}.get(itemsize, 8)
    dims = list(shape)
    dims[-1] = -(-dims[-1] // 128) * 128
    if len(dims) >= 2:
        dims[-2] = -(-dims[-2] // sublane) * sublane
    return math.prod(dims) * itemsize


def identity_copy(x: jax.Array) -> jax.Array:
    """Identity into a *distinct* buffer: direct HBM->HBM DMA (no VMEM bounce)."""
    orig_shape = x.shape
    if x.size == 0:
        return x  # nothing to copy

    # Give 0-d inputs a leading axis to DMA over (scalar reshape is free).
    x_in = x.reshape(1) if x.ndim == 0 else x
    itemsize = jnp.dtype(x.dtype).itemsize
    chunks = _plan_chunks(x_in.shape, itemsize)

    out = pl.pallas_call(
        _make_identity_dma_kernel(chunks),
        out_shape=jax.ShapeDtypeStruct(x_in.shape, x.dtype),
        in_specs=[pl.BlockSpec(memory_space=pl.ANY)],   # raw HBM ref, no auto-DMA
        out_specs=pl.BlockSpec(memory_space=pl.ANY),    # raw HBM ref, no auto-DMA
        scratch_shapes=[pltpu.SemaphoreType.DMA((len(chunks),))],
        # Purely memory bound: advertise the (padded) traffic so XLA can
        # schedule / overlap this custom call sensibly with neighboring ops.
        cost_estimate=pl.CostEstimate(
            flops=0,
            transcendentals=0,
            bytes_accessed=2 * _padded_bytes(x_in.shape, itemsize),
        ),
    )(x_in)

    return out.reshape(orig_shape)


def identity(x: jax.Array, copy: bool = False) -> jax.Array:
    """nn.Identity.forward(x) = x.

    Default path returns `x` unchanged (zero HBM traffic, zero launch overhead),
    matching PyTorch's Identity which returns the same tensor.  Pass copy=True
    only when a semantically distinct output buffer is required; that path runs
    the Pallas HBM->HBM DMA kernel above.
    """
    if not copy:
        return x
    return identity_copy(x)


if __name__ == "__main__":
    key = jax.random.PRNGKey(0)
    # NCHW input matching the DenseNet usage: batch=2, channels=4, spatial 16x16.
    x = jax.random.normal(key, (2, 4, 16, 16), dtype=jnp.float32)

    # Default (semantically faithful) path: no copy, no kernel, zero bytes moved.
    y0 = identity(x)
    assert y0 is x

    # Pallas DMA-copy path (exercised once here so the kernel runs on TPU).
    y = identity(x, copy=True)
    jax.block_until_ready(y)

    assert y.shape == x.shape, (y.shape, x.shape)
    assert y.dtype == x.dtype, (y.dtype, x.dtype)
    assert bool(jnp.array_equal(y, x))

    print("KERNEL_OK")
</pallas_src>

<mosaic_0001>
module attributes {stable_mosaic.version = 11 : i64} {
  func.func @kernel(%arg0: memref<2x4x16x16xf32, #tpu.memory_space<any>>, %arg1: memref<2x4x16x16xf32, #tpu.memory_space<any>>, %arg2: memref<1x!tpu.dma_semaphore, #tpu.memory_space<semaphore_mem>>) attributes {dimension_semantics = [], scalar_prefetch = 0 : i64, scratch_operands = 1 : i64, tpu.core_type = #tpu.core_type<tc>} {
    %c0_i32 = arith.constant 0 : i32
    %c0_i32_0 = arith.constant 0 : i32
    %c0_i32_1 = arith.constant 0 : i32
    %c0_i32_2 = arith.constant 0 : i32
    %c0_i32_3 = arith.constant 0 : i32
    %0 = tpu.memref_slice %arg0[%c0_i32_0, %c0_i32_1, %c0_i32_2, %c0_i32_3] : memref<2x4x16x16xf32, #tpu.memory_space<any>> -> memref<2x4x16x16xf32, #tpu.memory_space<any>>
    %c0_i32_4 = arith.constant 0 : i32
    %c0_i32_5 = arith.constant 0 : i32
    %c0_i32_6 = arith.constant 0 : i32
    %c0_i32_7 = arith.constant 0 : i32
    %1 = tpu.memref_slice %arg1[%c0_i32_4, %c0_i32_5, %c0_i32_6, %c0_i32_7] : memref<2x4x16x16xf32, #tpu.memory_space<any>> -> memref<2x4x16x16xf32, #tpu.memory_space<any>>
    %2 = tpu.memref_slice %arg2[%c0_i32] : memref<1x!tpu.dma_semaphore, #tpu.memory_space<semaphore_mem>> -> memref<1x!tpu.dma_semaphore, #tpu.memory_space<semaphore_mem>>
    %3 = tpu.memref_squeeze %2 : memref<1x!tpu.dma_semaphore, #tpu.memory_space<semaphore_mem>> -> memref<!tpu.dma_semaphore, #tpu.memory_space<semaphore_mem>>
    tpu.enqueue_dma source(%0 : memref<2x4x16x16xf32, #tpu.memory_space<any>>) target(%1 : memref<2x4x16x16xf32, #tpu.memory_space<any>>) target_semaphore(%3 : memref<!tpu.dma_semaphore, #tpu.memory_space<semaphore_mem>>)
    %c0_i32_8 = arith.constant 0 : i32
    %c0_i32_9 = arith.constant 0 : i32
    %c0_i32_10 = arith.constant 0 : i32
    %c0_i32_11 = arith.constant 0 : i32
    %c0_i32_12 = arith.constant 0 : i32
    %4 = tpu.memref_slice %arg0[%c0_i32_9, %c0_i32_10, %c0_i32_11, %c0_i32_12] : memref<2x4x16x16xf32, #tpu.memory_space<any>> -> memref<2x4x16x16xf32, #tpu.memory_space<any>>
    %c0_i32_13 = arith.constant 0 : i32
    %c0_i32_14 = arith.constant 0 : i32
    %c0_i32_15 = arith.constant 0 : i32
    %c0_i32_16 = arith.constant 0 : i32
    %5 = tpu.memref_slice %arg1[%c0_i32_13, %c0_i32_14, %c0_i32_15, %c0_i32_16] : memref<2x4x16x16xf32, #tpu.memory_space<any>> -> memref<2x4x16x16xf32, #tpu.memory_space<any>>
    %6 = tpu.memref_slice %arg2[%c0_i32_8] : memref<1x!tpu.dma_semaphore, #tpu.memory_space<semaphore_mem>> -> memref<1x!tpu.dma_semaphore, #tpu.memory_space<semaphore_mem>>
    %7 = tpu.memref_squeeze %6 : memref<1x!tpu.dma_semaphore, #tpu.memory_space<semaphore_mem>> -> memref<!tpu.dma_semaphore, #tpu.memory_space<semaphore_mem>>
    tpu.wait_dma2 semaphore(%7 : memref<!tpu.dma_semaphore, #tpu.memory_space<semaphore_mem>>) src(%4 : memref<2x4x16x16xf32, #tpu.memory_space<any>>) dst(%5 : memref<2x4x16x16xf32, #tpu.memory_space<any>>)
    return
  }
}

</mosaic_0001>

<bundles_post_ra>
// kernel: tpu_custom_call.1
= control target key start
LH: loop header
LB: loop body
LE: loop exit
PB: predicated region body
PF: predicated region fallthrough
CT: control target
= control target key end

     0   :  { %s34_s12 = smov [#allocation2]   ;;  %s35_s13 = smov [#allocation3]   ;;  %s53_s0 = inlined_call_operand.hbm [shape: f32[2,4,16,16], index: 0, kind: input, shape index: {}]   ;;  %s54_s1 = inlined_call_operand.hbm [shape: f32[2,4,16,16], index: 1, kind: output, shape index: {}]  }
   0x1   :  { %s10_s8 = sshll.u32 %s53_s0, 4  ;;  %s12_s11 = sshll.u32 %s54_s1, 4  ;;  %s11_s8 = int_to_ptr.hbm [resolvable:$true] %s10_s8  ;;  %s13_s11 = int_to_ptr.hbm [resolvable:$true] %s12_s11 }
   0x2   :  { %s36_s14 = smov 0  }
   0x3   :  { %16 = dma.general %s11_s8, 2048, %s13_s11, %s34_s12, %s35_s13, [#allocation4], %s36_s14, 0  }
   0x4   :  { %32 = dma.done.wait [#allocation2], 2048 }
   0x5   :  { %33 = vsyncadd [#allocation2], 4294965248 }
   0x6   :  { %22 = vsyncmov [#allocation2] }
   0x9   :  { %s23_s15 = vpop.sfrf %22 }
   0xa   :  { %p28_p0 = scmp.ne.s32.totalorder %s23_s15, 0 }
   0xc   :  { %27 = shalt.err (%p28_p0)  }

</bundles_post_ra>
